<compile_context>
chip_gen: v7x
topology: tpu7x:2x2x1
jax: 0.10.0
libtpu: 0.0.40
codegen_flags: <defaults>
</compile_context>

<pallas_src>
import jax
import jax.numpy as jnp
import numpy as np
from jax.experimental import pallas as pl
from jax.experimental.pallas import tpu as pltpu


def _vmem_capacity_bytes(default=64 << 20):
    """Per-generation VMEM capacity; conservative 64 MiB (v7x) fallback."""
    try:
        info = pltpu.get_tpu_info()
        for name in ("vmem_capacity_bytes", "vmem_bytes", "vmem_size_bytes"):
            v = getattr(info, name, None)
            if v:
                return int(v)
    except Exception:
        pass
    return default


def _pick_tile_windows(nw, bytes_per_window, sublane, target_bytes):
    """Largest sublane-aligned window tile whose activation block fits target."""
    nw_up = -(-nw // sublane) * sublane
    tw = (target_bytes // max(bytes_per_window, 1)) // sublane * sublane
    return int(max(sublane, min(tw, nw_up)))


def _make_kernel(TW, NW, tiles_per_split, needs_mask):
    """Grid = (batch, window_splits, window_tiles); axis 2 is the max-pool axis."""

    def kernel(x_ref, wc_ref, bc_ref, out_ref):
        s = pl.program_id(1)
        w = pl.program_id(2)

        @pl.when(w == 0)
        def _():
            out_ref[...] = jnp.full(out_ref.shape, -jnp.inf, out_ref.dtype)

        # Fused conv_1 + conv_2: one (TW, 8W) x (8W, 256) matmul, f32 accumulate.
        x = x_ref[0]                                                 # (TW, 8W)
        h = jnp.dot(x, wc_ref[...],
                    preferred_element_type=jnp.float32) + bc_ref[...]  # (TW, 256)
        gate = 0.5 * (jnp.tanh(0.5 * h[:, 128:]) + 1.0)              # == sigmoid
        gated = h[:, :128] * gate                                    # (TW, 128) f32

        if needs_mask:   # static trace-time branch: only when NW was padded
            base = (s * tiles_per_split + w) * TW
            row = base + jax.lax.broadcasted_iota(jnp.int32, (TW, 128), 0)
            gated = jnp.where(row < NW, gated, -jnp.inf)

        # Running max kept in an (8,128) vreg shape: per-step pure VPU maxima
        # across vregs; the 8->1 sublane reduce is deferred to the XLA epilogue.
        part = gated.reshape(TW // 8, 8, 128).max(axis=0)            # (8, 128)
        out_ref[0, 0] = jnp.maximum(out_ref[0, 0], part)

    return kernel


def malconv_forward(tokens, params, *, window_size, tile_windows=None,
                    window_splits=None, stream_dtype=jnp.bfloat16):
    B, L = tokens.shape
    W = window_size
    assert L % W == 0, "input length must be a multiple of window_size"
    NW = L // W
    C = 8 * W                                   # fused per-window feature width
    itemsize = jnp.dtype(stream_dtype).itemsize
    sublane = {4: 8, 2: 16, 1: 32}[itemsize]

    # --- wrapper glue: low-precision embedding gather, windows flattened, NO
    #     transpose (weights are statically reordered instead) -----------------
    emb_tab = params['embed'].astype(stream_dtype)        # cast the 2 KB table once
    x = jnp.take(emb_tab, tokens, axis=0).reshape(B, NW, C)   # (B, NW, 8W)

    # --- generation-aware tiling ----------------------------------------------
    vmem_cap = _vmem_capacity_bytes()
    target = max(1 << 20, vmem_cap // 16)       # ~8 MiB blocks on v5e/v6e, ~4 MiB on v7x
    if tile_windows is None:
        tile_windows = _pick_tile_windows(NW, C * itemsize, sublane, target)
    TW = tile_windows
    assert TW % sublane == 0, "tile_windows must be sublane-aligned for this dtype"

    NW_pad = -(-NW // TW) * TW
    tiles = NW_pad // TW
    if window_splits is None:                   # v7x: 2 TCs — split windows if B==1
        window_splits = 2 if (B == 1 and tiles % 2 == 0 and tiles >= 2) else 1
    S = window_splits
    assert tiles % S == 0, "window_splits must divide the number of window tiles"
    tps = tiles // S

    if NW_pad != NW:                            # pad; padded rows masked to -inf in-kernel
        x = jnp.pad(x, ((0, 0), (0, NW_pad - NW), (0, 0)))

    # Fused conv weight: row index k*8 + c matches the natural window flatten.
    w1 = params['conv1_w']                                   # (128, 4, W)
    w2 = params['conv2_w']
    wfull = jnp.zeros((W, 8, 256), jnp.float32)
    wfull = wfull.at[:, 0:4, 0:128].set(jnp.transpose(w1, (2, 1, 0)))
    wfull = wfull.at[:, 4:8, 128:256].set(jnp.transpose(w2, (2, 1, 0)))
    wfull = wfull.reshape(C, 256).astype(stream_dtype)       # (8W, 256)
    bfull = jnp.concatenate([params['conv1_b'], params['conv2_b']])
    bfull = bfull.reshape(1, 256).astype(jnp.float32)

    # Right-size the VMEM limit from the chosen tile (double-buffered blocks +
    # weights + slack), clamped to the generation's physical capacity.
    act_block = TW * C * itemsize
    w_bytes = C * 256 * itemsize + 256 * 4
    need = 2 * act_block + 2 * w_bytes + 2 * 8 * 128 * 4 + (4 << 20)
    vmem_limit = int(min(max(need, 32 << 20), vmem_cap - (8 << 20)))

    kernel = _make_kernel(TW, NW, tps, NW_pad != NW)

    def resident(*shape):                       # VMEM-resident weights/biases
        return pl.BlockSpec(shape, lambda b, s, w: (0,) * len(shape))

    out4 = pl.pallas_call(
        kernel,
        out_shape=jax.ShapeDtypeStruct((B, S, 8, 128), jnp.float32),
        grid_spec=pltpu.PrefetchScalarGridSpec(
            num_scalar_prefetch=0,
            grid=(B, S, tps),
            in_specs=[
                pl.BlockSpec((1, TW, C), lambda b, s, w: (b, s * tps + w, 0)),
                resident(C, 256),               # fused conv weight
                resident(1, 256),               # fused conv bias
            ],
            out_specs=pl.BlockSpec((1, 1, 8, 128), lambda b, s, w: (b, s, 0, 0)),
        ),
        compiler_params=pltpu.CompilerParams(
            dimension_semantics=("parallel", "parallel", "arbitrary"),
            vmem_limit_bytes=vmem_limit),
    )(x, wfull, bfull)

    # --- epilogue in plain XLA: finalize global max-pool, then fc_1 / fc_2 ----
    pooled = out4.max(axis=(1, 2))                            # (B, 128) f32
    y = pooled @ params['fc1_w'].T.astype(jnp.float32) + params['fc1_b'].astype(jnp.float32)
    return y @ params['fc2_w'].T.astype(jnp.float32) + params['fc2_b'].astype(jnp.float32)


def malconv_reference(tokens, params, *, window_size):
    """Pure-JAX reference mirroring the PyTorch forward."""
    B, L = tokens.shape
    W = window_size
    NW = L // W
    emb = jnp.take(params['embed'], tokens, axis=0)          # (B, L, 8)
    xT = jnp.transpose(emb, (0, 2, 1))                       # (B, 8, L)

    def conv(xc, w, b):                                      # xc: (B,4,L)  w: (128,4,W)
        xw = xc.reshape(B, 4, NW, W)
        return jnp.einsum('bcnk,ock->bon', xw, w) + b[None, :, None]

    cnn = conv(xT[:, 0:4], params['conv1_w'], params['conv1_b'])
    gate = jax.nn.sigmoid(conv(xT[:, 4:8], params['conv2_w'], params['conv2_b']))
    g = cnn * gate                                           # (B, 128, NW)
    pooled = g.max(axis=-1)                                  # (B, 128)
    y = pooled @ params['fc1_w'].T + params['fc1_b']
    return y @ params['fc2_w'].T + params['fc2_b']           # (B, 1)


if __name__ == "__main__":
    key = jax.random.PRNGKey(0)
    vocab_size = 256
    W = 16            # window_size (small)
    B = 2
    keys = jax.random.split(key, 8)

    embed = jax.random.normal(keys[0], (vocab_size, 8), jnp.float32) * 0.1
    embed = embed.at[0].set(0.0)                             # padding_idx = 0
    params = dict(
        embed=embed,
        conv1_w=jax.random.normal(keys[1], (128, 4, W), jnp.float32) * 0.05,
        conv1_b=jax.random.normal(keys[2], (128,), jnp.float32) * 0.05,
        conv2_w=jax.random.normal(keys[3], (128, 4, W), jnp.float32) * 0.05,
        conv2_b=jax.random.normal(keys[4], (128,), jnp.float32) * 0.05,
        fc1_w=jax.random.normal(keys[5], (128, 128), jnp.float32) * 0.05,
        fc1_b=jnp.zeros((128,), jnp.float32),
        fc2_w=jax.random.normal(keys[6], (1, 128), jnp.float32) * 0.05,
        fc2_b=jnp.zeros((1,), jnp.float32),
    )

    # Case 1: default path (bf16 streaming, auto tile / auto split), L=512 (NW=32).
    L = 512
    tok = jax.random.randint(keys[7], (B, L), 0, vocab_size, dtype=jnp.int32)
    ref = malconv_reference(tok, params, window_size=W)
    out = jax.block_until_ready(malconv_forward(tok, params, window_size=W))
    assert out.shape == (B, 1)
    # bf16 rounds embeddings + conv weights pre-matmul (can flip near-tied
    # windows in the max-pool); tolerance chosen accordingly.
    np.testing.assert_allclose(np.asarray(out), np.asarray(ref), rtol=2e-2, atol=2e-2)

    # Case 2: f32 streaming, multi-step running max + explicit 2-way window split.
    out_f32 = malconv_forward(tok, params, window_size=W, tile_windows=8,
                              window_splits=2, stream_dtype=jnp.float32)
    out_f32 = jax.block_until_ready(out_f32)
    np.testing.assert_allclose(np.asarray(out_f32), np.asarray(ref), rtol=1e-4, atol=1e-4)

    # Case 3: window count not divisible by the tile -> padded + masked in-kernel.
    L3 = 33 * W                                               # NW = 33 (awkward)
    tok3 = jax.random.randint(jax.random.PRNGKey(1), (1, L3), 0, vocab_size,
                              dtype=jnp.int32)
    ref3 = malconv_reference(tok3, params, window_size=W)
    out3 = malconv_forward(tok3, params, window_size=W, tile_windows=16,
                           stream_dtype=jnp.float32)
    out3 = jax.block_until_ready(out3)
    np.testing.assert_allclose(np.asarray(out3), np.asarray(ref3), rtol=1e-4, atol=1e-4)

    print("KERNEL_OK")
</pallas_src>

<mosaic_0001>
module attributes {stable_mosaic.version = 11 : i64} {
  func.func @kernel(%arg0: i32, %arg1: i32, %arg2: i32, %arg3: memref<1x32x128xbf16, #tpu.memory_space<vmem>>, %arg4: memref<128x256xbf16, #tpu.memory_space<vmem>>, %arg5: memref<1x256xf32, #tpu.memory_space<vmem>>, %arg6: memref<1x1x8x128xf32, #tpu.memory_space<vmem>>) attributes {dimension_semantics = [#tpu.dimension_semantics<parallel>, #tpu.dimension_semantics<parallel>, #tpu.dimension_semantics<arbitrary>], iteration_bounds = array<i64: 2, 1, 1>, scalar_prefetch = 0 : i64, scratch_operands = 0 : i64, tpu.core_type = #tpu.core_type<tc>, window_params = [{transform_indices = @transform_0, window_bounds = array<i64: 1, 32, 128>}, {pipeline_mode = #tpu.pipeline_mode<synchronous>, transform_indices = @transform_1, window_bounds = array<i64: 128, 256>}, {pipeline_mode = #tpu.pipeline_mode<synchronous>, transform_indices = @transform_2, window_bounds = array<i64: 1, 256>}, {transform_indices = @transform_3, window_bounds = array<i64: 1, 1, 8, 128>}]} {
    %c0_i32 = arith.constant 0 : i32
    %0 = arith.cmpi eq, %arg2, %c0_i32 : i32
    %1 = arith.extui %0 : i1 to i32
    %c0_i32_0 = arith.constant 0 : i32
    %2 = arith.cmpi ne, %1, %c0_i32_0 : i32
    scf.if %2 {
      %cst_19 = arith.constant 0xFF800000 : f32
      %28 = vector.broadcast %cst_19 : f32 to vector<1x1x8x128xf32>
      %c0_20 = arith.constant 0 : index
      %c0_21 = arith.constant 0 : index
      %c0_22 = arith.constant 0 : index
      %c0_23 = arith.constant 0 : index
      %29 = vector.load %arg6[%c0_20, %c0_21, %c0_22, %c0_23] : memref<1x1x8x128xf32, #tpu.memory_space<vmem>>, vector<1x1x8x128xf32>
      tpu.vector_store %arg6[%c0_20, %c0_21, %c0_22, %c0_23], %28 {strides = array<i32>} : memref<1x1x8x128xf32, #tpu.memory_space<vmem>>, vector<1x1x8x128xf32>,
    } else {
    }
    %c0 = arith.constant 0 : index
    %c0_1 = arith.constant 0 : index
    %c0_2 = arith.constant 0 : index
    %3 = vector.load %arg3[%c0, %c0_1, %c0_2] : memref<1x32x128xbf16, #tpu.memory_space<vmem>>, vector<1x32x128xbf16>
    %4 = vector.shape_cast %3 : vector<1x32x128xbf16> to vector<32x128xbf16>
    %c0_3 = arith.constant 0 : index
    %c0_4 = arith.constant 0 : index
    %5 = vector.load %arg4[%c0_3, %c0_4] : memref<128x256xbf16, #tpu.memory_space<vmem>>, vector<128x256xbf16>
    %cst = arith.constant dense<0.000000e+00> : vector<32x256xf32>
    %6 = tpu.matmul %4, %5, %cst {dimension_numbers = #tpu.dot_dimension_numbers<[1], [0], [0], [1], [0, 0, 1, 1], [], []>} : vector<32x128xbf16>, vector<128x256xbf16>, vector<32x256xf32> -> vector<32x256xf32>
    %c0_5 = arith.constant 0 : index
    %c0_6 = arith.constant 0 : index
    %7 = vector.load %arg5[%c0_5, %c0_6] : memref<1x256xf32, #tpu.memory_space<vmem>>, vector<1x256xf32>
    %8 = vector.broadcast %7 : vector<1x256xf32> to vector<32x256xf32>
    %9 = arith.addf %6, %8 : vector<32x256xf32>
    %10 = vector.extract_strided_slice %9 {offsets = [0, 128], sizes = [32, 128], strides = [1, 1]} : vector<32x256xf32> to vector<32x128xf32>
    %cst_7 = arith.constant 5.000000e-01 : f32
    %11 = vector.broadcast %cst_7 : f32 to vector<32x128xf32>
    %12 = arith.mulf %11, %10 : vector<32x128xf32>
    %13 = math.tanh %12 : vector<32x128xf32>
    %cst_8 = arith.constant 1.000000e+00 : f32
    %14 = vector.broadcast %cst_8 : f32 to vector<32x128xf32>
    %15 = arith.addf %13, %14 : vector<32x128xf32>
    %cst_9 = arith.constant 5.000000e-01 : f32
    %16 = vector.broadcast %cst_9 : f32 to vector<32x128xf32>
    %17 = arith.mulf %16, %15 : vector<32x128xf32>
    %18 = vector.extract_strided_slice %9 {offsets = [0, 0], sizes = [32, 128], strides = [1, 1]} : vector<32x256xf32> to vector<32x128xf32>
    %19 = arith.mulf %18, %17 : vector<32x128xf32>
    %20 = vector.shape_cast %19 : vector<32x128xf32> to vector<4x8x128xf32>
    %cst_10 = arith.constant dense<0xFF800000> : vector<8x128xf32>
    %21 = vector.multi_reduction <maximumf>, %20, %cst_10 [0] : vector<4x8x128xf32> to vector<8x128xf32>
    %c0_11 = arith.constant 0 : index
    %c0_12 = arith.constant 0 : index
    %c0_13 = arith.constant 0 : index
    %c0_14 = arith.constant 0 : index
    %22 = vector.load %arg6[%c0_11, %c0_12, %c0_13, %c0_14] : memref<1x1x8x128xf32, #tpu.memory_space<vmem>>, vector<1x1x8x128xf32>
    %23 = vector.shape_cast %22 : vector<1x1x8x128xf32> to vector<8x128xf32>
    %24 = arith.maximumf %23, %21 : vector<8x128xf32>
    %c0_15 = arith.constant 0 : index
    %c0_16 = arith.constant 0 : index
    %c0_17 = arith.constant 0 : index
    %c0_18 = arith.constant 0 : index
    %25 = vector.load %arg6[%c0_15, %c0_16, %c0_17, %c0_18] : memref<1x1x8x128xf32, #tpu.memory_space<vmem>>, vector<1x1x8x128xf32>
    %26 = vector.shape_cast %25 : vector<1x1x8x128xf32> to vector<8x128xf32>
    %27 = vector.shape_cast %24 : vector<8x128xf32> to vector<1x1x8x128xf32>
    tpu.vector_store %arg6[%c0_15, %c0_16, %c0_17, %c0_18], %27 {strides = array<i32>} : memref<1x1x8x128xf32, #tpu.memory_space<vmem>>, vector<1x1x8x128xf32>,
    return
  }
  func.func @transform_0(%arg0: i32, %arg1: i32, %arg2: i32) -> (i32, i32, i32) {
    %c1_i32 = arith.constant 1 : i32
    %0 = arith.muli %arg1, %c1_i32 : i32
    %1 = arith.addi %0, %arg2 : i32
    %c0_i32 = arith.constant 0 : i32
    %c0_i32_0 = arith.constant 0 : i32
    return %arg0, %1, %c0_i32 : i32, i32, i32
  }
  func.func @transform_1(%arg0: i32, %arg1: i32, %arg2: i32) -> (i32, i32) {
    %c0_i32 = arith.constant 0 : i32
    %c0_i32_0 = arith.constant 0 : i32
    %c0_i32_1 = arith.constant 0 : i32
    return %c0_i32, %c0_i32_0 : i32, i32
  }
  func.func @transform_2(%arg0: i32, %arg1: i32, %arg2: i32) -> (i32, i32) {
    %c0_i32 = arith.constant 0 : i32
    %c0_i32_0 = arith.constant 0 : i32
    %c0_i32_1 = arith.constant 0 : i32
    return %c0_i32, %c0_i32_0 : i32, i32
  }
  func.func @transform_3(%arg0: i32, %arg1: i32, %arg2: i32) -> (i32, i32, i32, i32) {
    %c0_i32 = arith.constant 0 : i32
    %c0_i32_0 = arith.constant 0 : i32
    %c0_i32_1 = arith.constant 0 : i32
    return %arg0, %arg1, %c0_i32, %c0_i32_0 : i32, i32, i32, i32
  }
}

</mosaic_0001>

<bundles_post_ra>
// kernel: tpu_custom_call.1
= control target key start
LH: loop header
LB: loop body
LE: loop exit
PB: predicated region body
PF: predicated region fallthrough
CT: control target
= control target key end

     0   :  { %8 = vsyncpa [#allocation3], 0  ;;  %s1117_s0 = inlined_call_operand.hbm [shape: bf16[2,32,128], index: 0, kind: input, shape index: {}]   ;;  %s1118_s1 = inlined_call_operand.hbm [shape: bf16[128,256], index: 1, kind: input, shape index: {}]   ;;  %s1119_s2 = inlined_call_operand.vmem [shape: f32[1,256], index: 2, kind: input, shape index: {}]   ;;  %s1120_s3 = inlined_call_operand.hbm [shape: f32[2,1,8,128], index: 3, kind: output, shape index: {}]  }
   0x1   :  { %10 = vsyncpa [#allocation3 + $0x1], 0 }
   0x2   :  { %11 = vsyncpa [#allocation6], 0 }
   0x3   :  { %12 = vsyncpa [#allocation4], 0 }
   0x4   :  { %14 = vsyncpa [#allocation4 + $0x1], 0  ;;  %s892_s12 = smov 0   ;;  %s894_s13 = smov 0  }
   0x5   :  { %s896_s14 = smov 0   ;;  %s898_s15 = smov 0  }
   0x6   :  { %s900_s16 = smov 0   ;;  %s902_s17 = smov 0  }
   0x7 LB: > { %s554_s18 = sadd.s32 4294967295, %s862_s17   ;;  %s555_s19 = sadd.s32 4294967294, %s862_s17   ;;  %s862_s17 = sphi %s902_s17, %s20_s17   ;;  %s858_s16 = sphi %s900_s16, %s1144_s16   ;;  %s854_s15 = sphi %s898_s15, %s1143_s15   ;;  %s850_s14 = sphi %s896_s14, %s1142_s14   ;;  %s846_s13 = sphi %s894_s13, %s1141_s13   ;;  %s842_s12 = sphi %s892_s12, %s1140_s12  }
   0x8   : > { %p63_p0 = scmp.ne.s32.totalorder %s846_s13, %s842_s12  ;;  %p926_p1 = scmp.eq.s32.totalorder %s554_s18, 0 }
   0x9   : > { %p930_p2 = scmp.eq.s32.totalorder %s554_s18, 1  ;;  %p137_p3 = scmp.eq.s32.totalorder %s555_s19, 1 }
   0xa   : > { %s1125_s20 = scalar_select %p926_p1, 1, 0 }
   0xb   : > { %s1126_s21 = scalar_select %p930_p2, 1, 0 }
   0xc   : > { %p936_p4 = por %p926_p1, %p63_p0  ;;  %p556_p5 = scmp.ge.s32.totalorder %s862_s17, 1 }
   0xd   : > { %p941_p6 = por %p137_p3, %p63_p0  ;;  %p144_p7 = scmp.lt.s32.totalorder %s862_s17, 3 }
   0xe   : > { %s1127_s22 = scalar_select %p936_p4, 1, 0 }
   0xf   : > { %s1128_s23 = scalar_select %p941_p6, 1, 0 }
  0x10   : > { %p946_p8 = pnand %p556_p5, %p144_p7  ;;  %s864_s25 = smov [#allocation5]  }
  0x11   : > { %s156_s26 = sshll.u32 %s864_s25, 4  ;;  %s39_s28 = sadd.s32 1, %s858_s16  ;;  %s157_s26 = int_to_ptr.vmem [resolvable:$true] %s156_s26 }
  0x12   : > { %s1129_s24 = scalar_select %p946_p8, 1, 0 }
  0x13   : > { %p613_p9 = pneg %p946_p8  ;;  %s718_s4 = scalar_lea.hbm %s1118_s1, 2048 }
  0x14   : > { %p719_p12 = scmp.ne.s32.totalorder %s1118_s1, %s718_s4  ;;  %p725_p5 = scmp.lt.u32.totalorder %s718_s4, %s1118_s1 }
  0x15   : > { %p955_p11 = pnand %p613_p9, %p926_p1 }
  0x17   : > { %p720_p13 = pneg %p955_p11 }
  0x19   : > { %p721_p0 = pnand %p720_p13, %p719_p12 }
  0x1b   : > { %p722_p3 = pneg %p721_p0 }
  0x1d   : > { %p727_p7 = pnand %p725_p5, %p722_p3 }
  0x1f   : > { %730 = shalt.err (!%p727_p7)
}
  0x20   : > { %s731_s9 = scalar_lea.vmem %s157_s26, 2048  ;;  %p739_p1 = scmp.lt.s32.totalorder %s157_s26, %s157_s26 }
  0x21   : > { %p732_p9 = scmp.ne.s32.totalorder %s157_s26, %s731_s9  ;;  %p740_p4 = scmp.lt.s32.totalorder %s731_s9, %s731_s9 }
  0x23   : > { %p734_p10 = pnand %p732_p9, %p720_p13  ;;  %p741_p8 = por %p740_p4, %p739_p1 }
  0x25   : > { %p735_p6 = pneg %p734_p10 }
  0x27   : > { %p742_p2 = pnand %p741_p8, %p735_p6 }
  0x29   : > { %745 = shalt.err (!%p742_p2)
}
  0x2a   : > { %s865_s10 = smov 128   ;;  %s866_s11 = smov 8  }
  0x2b   : > { %616 = dma.hbm_to_vmem [thread:$0]  (!%p955_p11), %s1118_s1, 2048, %s157_s26, [#allocation6], %s865_s10, %s865_s10, %s866_s11  }
  0x2c   : > { %p41_p1 = scmp.ge.s32.totalorder %s39_s28, 2  ;;  %s50_s25 = sadd.s32 1, %s850_s14 }
  0x2d   : > { %p57_p2 = scmp.ne.s32.totalorder %s850_s14, %s846_s13  ;;  %p58_p4 = scmp.eq.s32.totalorder %s862_s17, 0 }
  0x2e   : > { %s1146_s28 = smov (%p41_p1, %s39_s28), 0  ;;  %p1132_p8 = scmp.ne.s32.totalorder %s1126_s21, 0 }
  0x2f   : > { %p982_p6 = por %p58_p4, %p57_p2  ;;  %s45_s27 = ssub.s32 %s858_s16, %s1146_s28 }
  0x30   : > { %p988_p10 = por %p1132_p8, %p57_p2  ;;  %p626_p12 = scmp.lt.s32.totalorder %s862_s17, 2 }
  0x31   : > { %p48_p11 = scmp.eq.s32.totalorder %s45_s27, 0  ;;  %s173_s26 = sand.u32 1, %s850_s14  }
  0x32   : > { %s559_s4 = sshll.u32 %s173_s26, 4  ;;  %s588_s6 = sshll.u32 %s858_s16, 8 }
  0x33   : > { %s997_s5 = scalar_select %p48_p11, %s850_s14, %s50_s25  }
  0x34   : > { %s1003_s9 = scalar_lea.hbm %s1117_s0, %s588_s6  ;;  %s177_s21 = scalar_lea.vmem [#allocation2], %s559_s4 }
  0x35   : > { %s187_s10 = sshll.u32 %s177_s21, 4  ;;  %p1009_p13 = pnand %p626_p12, %p982_p6  ;;  %s1005_s10 = int_to_ptr.vmem [resolvable:$true] %s187_s10 }
  0x36   : > { %s1013_s18 = scalar_lea.sflag [#allocation3], %s173_s26  ;;  %s746_s19 = scalar_lea.hbm %s1003_s9, 256 }
  0x37   : > { %p747_p0 = scmp.ne.s32.totalorder %s1003_s9, %s746_s19  ;;  %p748_p3 = pneg %p1009_p13 }
  0x38   : > { %s751_s29 = scalar_lea.hbm %s1117_s0, 512  ;;  %p752_p9 = scmp.lt.u32.totalorder %s1003_s9, %s1117_s0 }
  0x39   : > { %p749_p5 = pnand %p748_p3, %p747_p0  ;;  %p753_p1 = scmp.lt.u32.totalorder %s751_s29, %s746_s19 }
  0x3a   : > { %p755_p4 = scmp.lt.u32.totalorder %s746_s19, %s1003_s9 }
  0x3b   : > { %p750_p7 = pneg %p749_p5  ;;  %p754_p2 = por %p753_p1, %p752_p9 }
  0x3d   : > { %p756_p6 = por %p755_p4, %p754_p2 }
  0x3f   : > { %p757_p8 = pnand %p756_p6, %p750_p7 }
  0x41   : > { %760 = shalt.err (!%p757_p8)
}
  0x42   : > { %s761_s26 = scalar_lea.vmem %s1005_s10, 256  ;;  %s867_s7 = smov [#allocation2]  }
  0x43   : > { %p762_p12 = scmp.ne.s32.totalorder %s1005_s10, %s761_s26  ;;  %s766_s8 = sshll.u32 %s867_s7, 4  ;;  %s767_s8 = int_to_ptr.vmem [resolvable:$false] %s766_s8 }
  0x44   : > { %s768_s21 = scalar_lea.vmem %s767_s8, 512  ;;  %p769_p5 = scmp.lt.s32.totalorder %s1005_s10, %s767_s8 }
  0x45   : > { %p764_p11 = pnand %p762_p12, %p748_p3  ;;  %p770_p9 = scmp.lt.s32.totalorder %s768_s21, %s761_s26 }
  0x47   : > { %p765_p0 = pneg %p764_p11  ;;  %p771_p1 = por %p770_p9, %p769_p5 }
  0x49   : > { %p772_p2 = pnand %p771_p1, %p765_p0 }
  0x4b   : > { %775 = shalt.err (!%p772_p2)
}
  0x4c   : > { %s868_s19 = smov 64   ;;  %s869_s25 = smov 4  }
  0x4d   : > { %620 = dma.hbm_to_vmem [thread:$0]  (!%p1009_p13), %s1003_s9, 256, %s1005_s10, %s1013_s18, %s868_s19, %s868_s19, %s869_s25  }
  0x4e   : > { %p1135_p3 = scmp.ne.s32.totalorder %s1129_s24, 0 }
  0x4f   : > { %s1044_s27 = sand.u32 (!%p1135_p3), 1, %s846_s13   ;;  %p1136_p7 = scmp.ne.s32.totalorder (!%p1135_p3), %s1127_s22, 0 }
  0x50   : > { %199 = sbr.rel (%p1135_p3) target bundleno = 380 (0x17c), region = 32  ;;  %s563_s29 = sshll.u32 (!%p1135_p3), %s1044_s27, 4 }
  0x51   : > { %s202_s4 = scalar_lea.sflag (!%p1135_p3), [#allocation3], %s1044_s27  ;;  %s1048_s6 = scalar_lea.vmem (!%p1135_p3), [#allocation2], %s563_s29 }
  0x57   : > { %829 = dma.done.wait (%p1136_p7), %s202_s4, 256  }
  0x58   : > { %831 = vsyncadd (%p1136_p7), %s202_s4, 4294967040  ;;  %p1137_p13 = scmp.ne.s32.totalorder %s1125_s20, 0 }
  0x5a   : > { %833 = dma.done.wait (%p1137_p13), [#allocation6], 2048  }
  0x5b   : > { %835 = vsyncadd (%p1137_p13), [#allocation6], 4294965248  ;;  %v870_v0 = vmov 0   ;;  %v684_v1 = vld [vmem:[#allocation5 + $0x4] ss:$8 sps:$4 sm:$0xff]   ;;  %v262_v19 = vlaneseq  ;;  %s565_s24 = sshll.u32 %s1044_s27, 3 }
  0x5c   : > { %396 = vmatprep.mubr.bf16.mxu0 %v870_v0  ;;  %406 = vmatprep.mubr.bf16.mxu1 %v870_v0  ;;  %v686_v2 = vld [vmem:[#allocation5] ss:$8 sps:$4 sm:$0xff]   ;;  %v687_v3 = vld [vmem:[#allocation5 + $0x14] ss:$8 sps:$4 sm:$0xff]   ;;  %v689_v4 = vld [vmem:[#allocation5 + $0x10] ss:$8 sps:$4 sm:$0xff]  }
  0x5d   : > { %364 = vmatprep.subr.bf16.mxu0 %v684_v1  ;;  %589 = vmatprep.subr.bf16.mxu1 %v684_v1  ;;  %v690_v5 = vld [vmem:[#allocation5 + $0x24] ss:$8 sps:$4 sm:$0xff]   ;;  %v692_v6 = vld [vmem:[#allocation5 + $0x20] ss:$8 sps:$4 sm:$0xff]   ;;  %v693_v7 = vld [vmem:[#allocation5 + $0x34] ss:$8 sps:$4 sm:$0xff]  }
  0x5e   : > { %365 = vmatpush1.bf16.msra.mxu0 %v686_v2  ;;  %597 = vmatpush1.bf16.msra.mxu1 %v686_v2  ;;  %v695_v8 = vld [vmem:[#allocation5 + $0x30] ss:$8 sps:$4 sm:$0xff]   ;;  %v696_v9 = vld [vmem:[#allocation5 + $0x44] ss:$8 sps:$4 sm:$0xff]   ;;  %v698_v10 = vld [vmem:[#allocation5 + $0x40] ss:$8 sps:$4 sm:$0xff]  }
  0x5f   : > { %366 = vmatprep.subr.bf16.mxu0 %v687_v3  ;;  %590 = vmatprep.subr.bf16.mxu1 %v687_v3  ;;  %v699_v11 = vld [vmem:[#allocation5 + $0x54] ss:$8 sps:$4 sm:$0xff]   ;;  %v701_v12 = vld [vmem:[#allocation5 + $0x50] ss:$8 sps:$4 sm:$0xff]   ;;  %v702_v13 = vld [vmem:[#allocation5 + $0x64] ss:$8 sps:$4 sm:$0xff]  }
  0x60   : > { %v704_v14 = vld [vmem:[#allocation5 + $0x60] ss:$8 sps:$4 sm:$0xff]   ;;  %v705_v15 = vld [vmem:[#allocation5 + $0x74] ss:$8 sps:$4 sm:$0xff]   ;;  %v707_v16 = vld [vmem:[#allocation5 + $0x70] ss:$8 sps:$4 sm:$0xff]  }
  0x61   : > { %v708_v17 = vld [vmem:[%s1048_s6] sm:$0xff]   ;;  %v709_v18 = vld [vmem:[%s1048_s6 + $0x8] sm:$0xff]   ;;  %v263_v20 = vshrl.u32 %v262_v19, 7  ;;  %s585_s9 = sshll.u32 %s854_s15, 7  ;;  %s231_s10 = scalar_lea.vmem [#allocation7], %s565_s24 }
  0x62   : > { %367 = vmatpush1.bf16.msra.mxu0 %v689_v4  ;;  %598 = vmatpush1.bf16.msra.mxu1 %v689_v4  ;;  %v260_v22 = vld [vmem:[%s1119_s2] sm:$0x3]  ;;  %s458_s11 = sshll.u32 %s231_s10, 4  ;;  %s1068_s7 = scalar_lea.hbm %s1120_s3, %s585_s9  ;;  %s1070_s11 = int_to_ptr.vmem [resolvable:$true] %s458_s11 }
  0x63   : > { %368 = vmatprep.subr.bf16.mxu0 %v690_v5  ;;  %591 = vmatprep.subr.bf16.mxu1 %v690_v5  ;;  %v268_v21 = vsub.s32 1, %v263_v20  ;;  %v264_v40 = vsub.s32 0, %v263_v20  ;;  %s444_s8 = scalar_lea.sflag [#allocation4], %s1044_s27  ;;  %s776_s21 = scalar_lea.vmem %s1070_s11, 128 }
  0x64   : > { %p777_p4 = scmp.ne.s32.totalorder %s1070_s11, %s776_s21  ;;  %s871_s15 = smov [#allocation7]  }
  0x65   : > { %v269_v23 = vrot.slane %v260_v22, %v268_v21  ;;  %v265_v41 = vrot.slane %v260_v22, %v264_v40  ;;  %s780_s19 = sshll.u32 %s871_s15, 4  ;;  %s781_s19 = int_to_ptr.vmem [resolvable:$false] %s780_s19 }
  0x66   : > { %369 = vmatpush1.bf16.msra.mxu0 %v692_v6  ;;  %599 = vmatpush1.bf16.msra.mxu1 %v692_v6  ;;  %p778_p6 = pnand %p777_p4, %p988_p10  ;;  %s782_s25 = scalar_lea.vmem %s781_s19, 256 }
  0x67   : > { %370 = vmatprep.subr.bf16.mxu0 %v693_v7  ;;  %592 = vmatprep.subr.bf16.mxu1 %v693_v7  ;;  %p783_p12 = scmp.lt.s32.totalorder %s1070_s11, %s781_s19  ;;  %p784_p11 = scmp.lt.s32.totalorder %s782_s25, %s776_s21 }
  0x68   : > { %p779_p8 = pneg %p778_p6 }
  0x69   : > { %p785_p0 = por %p784_p11, %p783_p12 }
  0x6a   : > { %371 = vmatpush1.bf16.msra.mxu0 %v695_v8  ;;  %600 = vmatpush1.bf16.msra.mxu1 %v695_v8 }
  0x6b   : > { %372 = vmatprep.subr.bf16.mxu0 %v696_v9  ;;  %593 = vmatprep.subr.bf16.mxu1 %v696_v9  ;;  %p786_p5 = pnand %p785_p0, %p779_p8 }
  0x6e   : > { %373 = vmatpush1.bf16.msra.mxu0 %v698_v10  ;;  %601 = vmatpush1.bf16.msra.mxu1 %v698_v10 }
  0x6f   : > { %374 = vmatprep.subr.bf16.mxu0 %v699_v11  ;;  %594 = vmatprep.subr.bf16.mxu1 %v699_v11 }
  0x72   : > { %375 = vmatpush1.bf16.msra.mxu0 %v701_v12  ;;  %602 = vmatpush1.bf16.msra.mxu1 %v701_v12 }
  0x73   : > { %376 = vmatprep.subr.bf16.mxu0 %v702_v13  ;;  %595 = vmatprep.subr.bf16.mxu1 %v702_v13 }
  0x76   : > { %377 = vmatpush1.bf16.msra.mxu0 %v704_v14  ;;  %603 = vmatpush1.bf16.msra.mxu1 %v704_v14 }
  0x77   : > { %378 = vmatprep.subr.bf16.mxu0 %v705_v15  ;;  %596 = vmatprep.subr.bf16.mxu1 %v705_v15 }
  0x7a   : > { %379 = vmatpush1.bf16.msra.mxu0 %v707_v16  ;;  %604 = vmatpush1.bf16.msra.mxu1 %v707_v16 }
  0x7d   : > { %397 = vmatmul.mubr.bf16.vlgmr.msra.gmra.mrb[0].mxu0 %v708_v17  ;;  %407 = vmatmul.mubr.bf16.vlgmr.msra.gmra.mrb[0].mxu1 %v709_v18 }
 0x150   : > { %v398_v24 = vpop.f32.mrb[0].mxu0  ;;  %v408_v25 = vpop.f32.mrb[0].mxu1 }
 0x151   : > { %v400_v26 = vpop.f32.mrb[1].mxu0  ;;  %v410_v27 = vpop.f32.mrb[1].mxu1  ;;  %v399_v48 = vadd.f32 %v398_v24, %v265_v41  ;;  %v409_v51 = vadd.f32 %v408_v25, %v265_v41 }
 0x152   : > { %v401_v28 = vadd.f32 %v400_v26, %v269_v23  ;;  %v411_v29 = vadd.f32 %v410_v27, %v269_v23  ;;  %v402_v30 = vpop.f32.mrb[2].mxu0  ;;  %v412_v31 = vpop.f32.mrb[2].mxu1 }
 0x153   : > { %v404_v32 = vpop.f32.mrb[3].mxu0  ;;  %v414_v33 = vpop.f32.mrb[3].mxu1  ;;  %v403_v55 = vadd.f32 %v402_v30, %v265_v41  ;;  %v413_v58 = vadd.f32 %v412_v31, %v265_v41 }
 0x154   : > { %v417_v34 = vmul.f32 0.5, %v401_v28  ;;  %v419_v35 = vmul.f32 0.5, %v411_v29  ;;  %v405_v36 = vadd.f32 %v404_v32, %v269_v23  ;;  %v415_v37 = vadd.f32 %v414_v33, %v269_v23 }
 0x156   : > { %710 = vtanh.f32 %v417_v34  ;;  %v418_v38 = vmul.f32 0.5, %v405_v36  ;;  %v420_v39 = vmul.f32 0.5, %v415_v37 }
 0x157   : > { %712 = vtanh.f32 %v419_v35 }
 0x158   : > { %714 = vtanh.f32 %v418_v38 }
 0x159   : > { %716 = vtanh.f32 %v420_v39 }
 0x160   : > { %v711_v42 = vpop.eup %710 }
 0x161   : > { %v713_v43 = vpop.eup %712  ;;  %v425_v44 = vadd.f32 1.0, %v711_v42 }
 0x162   : > { %v715_v45 = vpop.eup %714  ;;  %v427_v46 = vadd.f32 1.0, %v713_v43 }
 0x163   : > { %v717_v47 = vpop.eup %716  ;;  %v429_v49 = vmul.f32 0.5, %v425_v44  ;;  %v426_v50 = vadd.f32 1.0, %v715_v45 }
 0x164   : > { %v431_v52 = vmul.f32 0.5, %v427_v46  ;;  %v428_v53 = vadd.f32 1.0, %v717_v47 }
 0x165   : > { %v433_v54 = vmul.f32 %v429_v49, %v399_v48  ;;  %v430_v56 = vmul.f32 0.5, %v426_v50 }
 0x166   : > { %v435_v57 = vmul.f32 %v431_v52, %v409_v51  ;;  %v432_v59 = vmul.f32 0.5, %v428_v53 }
 0x167   : > { %v434_v60 = vmul.f32 %v430_v56, %v403_v55 }
 0x168   : > { %v436_v61 = vmul.f32 %v432_v59, %v413_v58 }
 0x169   : > { %v437_v62 = vmax.f32 %v433_v54, %v434_v60 }
 0x16a   : > { %v438_v63 = vmax.f32 %v435_v57, %v436_v61 }
 0x16c   : > { %v439_v0 = vmax.f32 %v437_v62, %v438_v63 }
 0x16e   : > { %442 = vst [vmem:[%s231_s10] sm:$0xff] %v439_v0 }
 0x16f   : > { %789 = shalt.err (!%p786_p5)
}
 0x170   : > { %s790_s27 = scalar_lea.hbm %s1068_s7, 128  ;;  %s794_s6 = scalar_lea.hbm %s1120_s3, 256 }
 0x171   : > { %p791_p9 = scmp.ne.s32.totalorder %s1068_s7, %s790_s27  ;;  %p795_p3 = scmp.lt.u32.totalorder %s1068_s7, %s1120_s3 }
 0x172   : > { %p796_p7 = scmp.lt.u32.totalorder %s794_s6, %s790_s27  ;;  %p798_p4 = scmp.lt.u32.totalorder %s790_s27, %s1068_s7 }
 0x173   : > { %p792_p1 = pnand %p791_p9, %p988_p10 }
 0x174   : > { %p797_p13 = por %p796_p7, %p795_p3 }
 0x175   : > { %p793_p2 = pneg %p792_p1 }
 0x176   : > { %p799_p6 = por %p798_p4, %p797_p13 }
 0x178   : > { %p800_p8 = pnand %p799_p6, %p793_p2 }
 0x17a   : > { %803 = shalt.err (!%p800_p8)
}
 0x17b   : > { %611 = dma.vmem_to_hbm [thread:$0]  (%p988_p10), %s1070_s11, 128, %s1068_s7, %s444_s8  }
 0x17c PF: > { %s470_s24 = sand.u32 1, %s842_s12   ;;  %p1138_p12 = scmp.ne.s32.totalorder %s1128_s23, 0 }
 0x17d   : > { %p1139_p11 = scmp.ge.s32.totalorder %s862_s17, 2  ;;  %s471_s9 = scalar_lea.sflag [#allocation4], %s470_s24 }
 0x17f   : > { %p622_p0 = pnand %p1139_p11, %p1138_p12 }
 0x181   : > { %837 = dma.done.wait (!%p622_p0), %s471_s9, 128  }
 0x182   : > { %839 = vsyncadd (!%p622_p0), %s471_s9, 4294967168  ;;  %s20_s17 = sadd.s32 1, %s862_s17   ;;  %s1140_s12 = smov %s846_s13 }
 0x183   : > { %p17_p5 = scmp.ge.s32.totalorder %s20_s17, 4   ;;  %s1141_s13 = smov %s850_s14 }
 0x184   : > { %s1142_s14 = smov %s997_s5  ;;  %s1143_s15 = smov %s858_s16 }
 0x185   : > { %s1144_s16 = smov %s1146_s28  ;;  %19 = sbr.rel (!%p17_p5) target bundleno = 7 (0x7), region = 85 }
 0x18c   :  { %476 = vsyncpa [#allocation3], 1 }
 0x18d   :  { %478 = vsyncpa [#allocation3 + $0x1], 1 }
 0x18e   :  { %479 = vsyncpa [#allocation6], 1 }
 0x18f   :  { %480 = vsyncpa [#allocation4], 1 }
 0x190   :  { %482 = vsyncpa [#allocation4 + $0x1], 1 }

</bundles_post_ra>
